<compile_context>
chip_gen: v7x
topology: tpu7x:2x2x1
jax: 0.10.0
libtpu: 0.0.40
codegen_flags: <defaults>
</compile_context>

<pallas_src>
import jax
import jax.numpy as jnp
from jax import lax
from jax.experimental import pallas as pl
from jax.experimental.pallas import tpu as pltpu

D = 256            # in_feature (small, lane-aligned)
CLASS_NUM = 8      # class_num
B = 8              # batch (sublane-aligned)
S = 16             # seq length of x[0] (unused by this module; shape fidelity only)


# --------------------------------------------------------------------------
# Kernel: dropout(identity) + Linear head, compact torch-layout weight
# --------------------------------------------------------------------------
def _cls_kernel(x_ref, w_ref, b_ref, o_ref):
    """x_ref: (B, D)   w_ref: (C, D)   b_ref: (1, C)   o_ref: (B, C)."""
    # nn.Dropout is identity at inference time.
    logits = lax.dot_general(
        x_ref[...], w_ref[...],
        dimension_numbers=(((1,), (1,)), ((), ())),   # contract D with D
        preferred_element_type=jnp.float32,
    )
    o_ref[...] = logits + b_ref[...]


def cls_head(x1, w, b2d):
    """x1 (B, D), w (C, D), b2d (1, C) -> (B, C) logits."""
    Bn, Dn = x1.shape
    C = w.shape[0]
    return pl.pallas_call(
        _cls_kernel,
        out_shape=jax.ShapeDtypeStruct((Bn, C), jnp.float32),
        in_specs=[
            pl.BlockSpec(memory_space=pltpu.MemorySpace.VMEM),
            pl.BlockSpec(memory_space=pltpu.MemorySpace.VMEM),
            pl.BlockSpec(memory_space=pltpu.MemorySpace.VMEM),
        ],
        out_specs=pl.BlockSpec(memory_space=pltpu.MemorySpace.VMEM),
        cost_estimate=pl.CostEstimate(
            flops=2 * Bn * Dn * C,
            transcendentals=0,
            bytes_accessed=(Bn * Dn + C * Dn + C + Bn * C) * 4,
        ),
    )(x1, w, b2d)


# --------------------------------------------------------------------------
# Parameters (deterministic, synthetic -- matches the PyTorch init_weights)
# --------------------------------------------------------------------------
def init_params(key, in_feature=D, class_num=CLASS_NUM):
    # nn.init.xavier_normal_ on a (class_num, in_feature) weight; zero bias.
    scale = jnp.sqrt(2.0 / (in_feature + class_num))
    W = scale * jax.random.normal(key, (class_num, in_feature), jnp.float32)
    b = jnp.zeros((class_num,), jnp.float32)
    return {"W": W, "b": b}


def prepare_packed_params(params):
    """One-time prep: keep weight in natural (C, D) layout, bias as (1, C)."""
    return {"W": params["W"], "b2d": params["b"].reshape(1, -1)}


# --------------------------------------------------------------------------
# Forward pass
# --------------------------------------------------------------------------
def cls_forward(packed, x):
    x1 = x[1]                                   # (B, D)
    return cls_head(x1, packed["W"], packed["b2d"])   # (B, class_num)


# --------------------------------------------------------------------------
# Pure-JAX reference (mirrors the PyTorch forward exactly, eval mode)
# --------------------------------------------------------------------------
def forward_ref(params, x):
    return x[1] @ params["W"].T + params["b"]


if __name__ == "__main__":
    key = jax.random.PRNGKey(0)
    k_param, k0, k1 = jax.random.split(key, 3)

    params = init_params(k_param)
    packed = prepare_packed_params(params)

    # x is a tuple; the module only touches x[1].
    x0 = jax.random.normal(k0, (B, S, D), jnp.float32)   # x[0] (unused by forward)
    x1 = jax.random.normal(k1, (B, D), jnp.float32)      # x[1]
    x = (x0, x1)

    out = cls_forward(packed, x)
    jax.block_until_ready(out)

    ref = forward_ref(params, x)
    assert out.shape == (B, CLASS_NUM)
    assert jnp.allclose(out, ref, atol=1e-4, rtol=1e-4)

    print("KERNEL_OK")
</pallas_src>

<mosaic_0001>
module attributes {stable_mosaic.version = 11 : i64} {
  func.func @_cls_kernel(%arg0: memref<8x256xf32, #tpu.memory_space<vmem>>, %arg1: memref<8x256xf32, #tpu.memory_space<vmem>>, %arg2: memref<1x8xf32, #tpu.memory_space<vmem>>, %arg3: memref<8x8xf32, #tpu.memory_space<vmem>>) attributes {dimension_semantics = [], scalar_prefetch = 0 : i64, scratch_operands = 0 : i64, tpu.core_type = #tpu.core_type<tc>} {
    %c0 = arith.constant 0 : index
    %c0_0 = arith.constant 0 : index
    %0 = vector.load %arg0[%c0, %c0_0] : memref<8x256xf32, #tpu.memory_space<vmem>>, vector<8x256xf32>
    %c0_1 = arith.constant 0 : index
    %c0_2 = arith.constant 0 : index
    %1 = vector.load %arg1[%c0_1, %c0_2] : memref<8x256xf32, #tpu.memory_space<vmem>>, vector<8x256xf32>
    %cst = arith.constant dense<0.000000e+00> : vector<8x8xf32>
    %2 = tpu.matmul %0, %1, %cst {dimension_numbers = #tpu.dot_dimension_numbers<[1], [1], [0], [0], [0, 0, 1, 0], [], []>} : vector<8x256xf32>, vector<8x256xf32>, vector<8x8xf32> -> vector<8x8xf32>
    %c0_3 = arith.constant 0 : index
    %c0_4 = arith.constant 0 : index
    %3 = vector.load %arg2[%c0_3, %c0_4] : memref<1x8xf32, #tpu.memory_space<vmem>>, vector<1x8xf32>
    %4 = vector.broadcast %3 : vector<1x8xf32> to vector<8x8xf32>
    %5 = arith.addf %2, %4 : vector<8x8xf32>
    %c0_5 = arith.constant 0 : index
    %c0_6 = arith.constant 0 : index
    %6 = vector.load %arg3[%c0_5, %c0_6] : memref<8x8xf32, #tpu.memory_space<vmem>>, vector<8x8xf32>
    tpu.vector_store %arg3[%c0_5, %c0_6], %5 {strides = array<i32>} : memref<8x8xf32, #tpu.memory_space<vmem>>, vector<8x8xf32>,
    return
  }
}

</mosaic_0001>

<bundles_post_ra>
// kernel: tpu_custom_call.1
= control target key start
LH: loop header
LB: loop body
LE: loop exit
PB: predicated region body
PF: predicated region fallthrough
CT: control target
= control target key end

     0   :  { %8 = vsyncpa [#allocation3], 0  ;;  %s276_s0 = inlined_call_operand.hbm [shape: f32[8,256], index: 0, kind: input, shape index: {}]   ;;  %s277_s1 = inlined_call_operand.hbm [shape: f32[8,256], index: 1, kind: input, shape index: {}]   ;;  %s278_s2 = inlined_call_operand.vmem [shape: f32[1,8], index: 2, kind: input, shape index: {}]   ;;  %s279_s3 = inlined_call_operand.hbm [shape: f32[8,8], index: 3, kind: output, shape index: {}]  }
   0x1   :  { %9 = vsyncpa [#allocation6], 0 }
   0x2   :  { %10 = vsyncpa [#allocation4], 0  ;;  %s214_s12 = smov [#allocation2]   ;;  %s215_s14 = smov [#allocation5]  }
   0x3   :  { %s17_s13 = sshll.u32 %s214_s12, 4  ;;  %s27_s15 = sshll.u32 %s215_s14, 4  ;;  %s18_s13 = int_to_ptr.vmem [resolvable:$true] %s17_s13  ;;  %s28_s15 = int_to_ptr.vmem [resolvable:$true] %s27_s15 }
   0x4   :  { %s142_s18 = scalar_lea.hbm %s276_s0, 256 }
   0x5   :  { %p143_p0 = scmp.ne.s32.totalorder %s276_s0, %s142_s18  ;;  %p146_p1 = scmp.lt.u32.totalorder %s142_s18, %s276_s0 }
   0x7   :  { %p148_p2 = pnand %p146_p1, %p143_p0 }
   0x9   :  { %151 = shalt.err (!%p148_p2)
}
   0xa   :  { %s152_s23 = scalar_lea.vmem %s18_s13, 256  ;;  %p157_p4 = scmp.lt.s32.totalorder %s18_s13, %s18_s13 }
   0xb   :  { %p153_p3 = scmp.ne.s32.totalorder %s18_s13, %s152_s23  ;;  %p158_p5 = scmp.lt.s32.totalorder %s152_s23, %s152_s23 }
   0xd   :  { %p159_p6 = por %p158_p5, %p157_p4 }
   0xf   :  { %p160_p7 = pnand %p159_p6, %p153_p3 }
  0x11   :  { %163 = shalt.err (!%p160_p7)
}
  0x12   :  { %20 = dma.hbm_to_vmem [thread:$0]  %s276_s0, 256, %s18_s13, [#allocation3]  }
  0x13   :  { %s164_s28 = scalar_lea.hbm %s277_s1, 256 }
  0x14   :  { %p165_p8 = scmp.ne.s32.totalorder %s277_s1, %s164_s28  ;;  %p168_p9 = scmp.lt.u32.totalorder %s164_s28, %s277_s1 }
  0x16   :  { %p170_p10 = pnand %p168_p9, %p165_p8 }
  0x18   :  { %173 = shalt.err (!%p170_p10)
}
  0x19   :  { %s174_s6 = scalar_lea.vmem %s28_s15, 256  ;;  %p179_p12 = scmp.lt.s32.totalorder %s28_s15, %s28_s15 }
  0x1a   :  { %p175_p11 = scmp.ne.s32.totalorder %s28_s15, %s174_s6  ;;  %p180_p13 = scmp.lt.s32.totalorder %s174_s6, %s174_s6 }
  0x1c   :  { %p181_p0 = por %p180_p13, %p179_p12 }
  0x1e   :  { %p182_p1 = pnand %p181_p0, %p175_p11 }
  0x20   :  { %185 = shalt.err (!%p182_p1)
}
  0x21   :  { %30 = dma.hbm_to_vmem [thread:$0]  %s277_s1, 256, %s28_s15, [#allocation6]  }
  0x22   :  { %208 = dma.done.wait [#allocation3], 256  }
  0x23   :  { %209 = vsyncadd [#allocation3], 4294967040 }
  0x24   :  { %210 = dma.done.wait [#allocation6], 256  }
  0x25   :  { %211 = vsyncadd [#allocation6], 4294967040  ;;  %v42_v0 = vld [vmem:[#allocation5 + $0x8] sm:$0xff]  ;;  %v41_v1 = vld [vmem:[#allocation5] sm:$0xff]  ;;  %s216_s10 = smov [#allocation7]   ;;  %vm120_vm0 = vcmask 64512  }
  0x26   :  { %v40_v2 = vld [vmem:[#allocation2 + $0x8] sm:$0xff]  ;;  %50 = vmatprep.subr.mxu0 %v42_v0  ;;  %v39_v3 = vld [vmem:[#allocation2] sm:$0xff]  ;;  %s128_s11 = sshll.u32 %s216_s10, 4  ;;  %s129_s11 = int_to_ptr.vmem [resolvable:$true] %s128_s11 }
  0x27   :  { %114 = vmatprep.mubr.f32.mxu0 %v40_v2  ;;  %51 = vmatpush1.xpose.msra.mxu0 %v41_v1  ;;  %v138_v4 = vld [vmem:[%s278_s2] ss:$0 sm:$0xff]  ;;  %s186_s1 = scalar_lea.vmem %s129_s11, 128  ;;  %p191_p3 = scmp.lt.s32.totalorder %s129_s11, %s129_s11 }
  0x28   :  { %p187_p2 = scmp.ne.s32.totalorder %s129_s11, %s186_s1  ;;  %p192_p4 = scmp.lt.s32.totalorder %s186_s1, %s186_s1 }
  0x2a   :  { %115 = vmatmul.mubr.f32.vlgmr.msra.gmra.mrb[0].mxu0 %v39_v3  ;;  %p193_p5 = por %p192_p4, %p191_p3 }
  0x2c   :  { %p194_p6 = pnand %p193_p5, %p187_p2 }
  0xfd   :  { %v116_v5 = vpop.f32.mrb[0].mxu0 }
  0xfe   :  { %v117_v6 = vadd.f32 %v138_v4, %v116_v5  ;;  %v118_v7 = vpop.f32.mrb[1].mxu0 }
 0x100   :  { %121 = vst.msk [vmem:[#allocation7] sm:$0xff] %vm120_vm0, %v117_v6 }
 0x101   :  { %197 = shalt.err (!%p194_p6)
}
 0x102   :  { %s198_s14 = scalar_lea.hbm %s279_s3, 128 }
 0x103   :  { %p199_p7 = scmp.ne.s32.totalorder %s279_s3, %s198_s14  ;;  %p202_p8 = scmp.lt.u32.totalorder %s198_s14, %s279_s3 }
 0x105   :  { %p204_p9 = pnand %p202_p8, %p199_p7 }
 0x107   :  { %207 = shalt.err (!%p204_p9)
}
 0x108   :  { %131 = dma.vmem_to_hbm [thread:$0]  %s129_s11, 128, %s279_s3, [#allocation4]  }
 0x109   :  { %212 = dma.done.wait [#allocation4], 128  }
 0x10a   :  { %213 = vsyncadd [#allocation4], 4294967168 }
 0x10b   :  { %135 = vsyncpa [#allocation3], 1 }
 0x10c   :  { %136 = vsyncpa [#allocation6], 1 }
 0x10d   :  { %137 = vsyncpa [#allocation4], 1 }

</bundles_post_ra>
